<compile_context>
chip_gen: v7x
topology: tpu7x:2x2x1
jax: 0.10.0
libtpu: 0.0.40
codegen_flags: <defaults>
</compile_context>

<pallas_src>
import jax
import jax.numpy as jnp
from jax.experimental import pallas as pl
from jax.experimental.pallas import tpu as pltpu

HALF = jnp.bfloat16  # on-TPU stand-in for torch.float16


def _round_up(x: int, m: int) -> int:
    return ((x + m - 1) // m) * m


def _cdiv(a: int, b: int) -> int:
    return -(-a // b)


def _divisor_tile(dim: int, target: int, quantum: int) -> int:
    """Largest multiple of `quantum` that divides `dim` and is <= target.

    If `dim` is not a multiple of `quantum`, use the full extent (a block equal
    to the full array dim is always legal, no padding needed).
    TODO(synk): very large ragged dims would be better pre-padded once at init.
    """
    if dim % quantum:
        return dim
    t = (min(target, dim) // quantum) * quantum
    while t > quantum:
        if dim % t == 0:
            return t
        t -= quantum
    return quantum


def _pick_tile_defaults():
    """Per-generation tile defaults (roofline-sized, VMEM-budgeted)."""
    vmem_cap = None
    try:
        vmem_cap = pltpu.get_tpu_info().vmem_capacity_bytes
    except Exception:  # pragma: no cover - info query is best-effort
        vmem_cap = None
    if vmem_cap is not None and vmem_cap >= (96 << 20):
        # v5e / v6e class (128 MiB VMEM): 2048x1024 gives ~683 flop/B, clears
        # the v6e roofline; v5e is already compute-bound so this is harmless.
        return 2048, 1024, 512
    # v7x class (64 MiB physical / 32 MiB scoped) or unknown: ~20-26 MiB
    # resident with the accumulator merged into o_ref.
    return 1536, 1024, 512


def float16_module_kernel(x_ref, w_ref, b_ref, o_ref):
    """Half matmul, fp32 accumulation directly into the K-resident o_ref."""
    k = pl.program_id(2)

    @pl.when(k == 0)
    def _():
        o_ref[...] = jnp.zeros_like(o_ref)

    # fp32_to_float16 on the activations (no-op if the wrapper already cast).
    x_half = x_ref[...].astype(HALF)
    # Inner loop: pure MXU push + fp32 accumulate into the output block.
    o_ref[...] += jnp.dot(x_half, w_ref[...], preferred_element_type=jnp.float32)

    @pl.when(k == pl.num_programs(2) - 1)
    def _():
        # Wrapped module finishes in half precision (bias add, half output),
        # then Float16Module's float16_to_fp32 converts back to fp32.
        y = o_ref[...] + b_ref[...].astype(jnp.float32)
        o_ref[...] = y.astype(HALF).astype(jnp.float32)


def float16_module_forward(x_f32, w_half, b_half, *, tm=None, tn=None, tk=None):
    """Float16Module.forward for a Linear inner module.

    x_f32 : [B, S, H] float32   (what Float16Module.forward receives)
    w_half: [H, O]    bfloat16  (module.half() parameters, final layout)
    b_half: [O]       bfloat16
    returns [B, S, O] float32
    """
    B, S, H = x_f32.shape
    _, O = w_half.shape
    M = B * S

    tm_d, tn_d, tk_d = _pick_tile_defaults()
    tm = tm_d if tm is None else tm
    tn = tn_d if tn is None else tn
    tk = tk_d if tk is None else tk

    # N / K tiles must exactly divide (or be full-extent) so no padding or
    # post-kernel slicing is needed.  Zero K-padding is only required for
    # ragged K, which the full-extent fallback avoids entirely.
    tn = _divisor_tile(O, tn, 128)
    tk = _divisor_tile(H, tk, 128)
    grid_n = _cdiv(O, tn)
    grid_k = _cdiv(H, tk)

    # Wrapper-side fp32->half cast only pays off when the activations are
    # re-read many times across the N grid; otherwise cast inside the kernel
    # (removes a full HBM pass over x).
    x2 = x_f32.reshape(M, H)
    precast = grid_n > 3
    if precast:
        x2 = x2.astype(HALF)
    qm = 16 if precast else 8  # sublane quantum for the x / output blocks

    # Balanced M tiling (avoids up-to-2x zero-padding waste near boundaries).
    tm_req = max(qm, min(tm, _round_up(M, qm)))
    n_m = _cdiv(M, tm_req)
    tm = _round_up(_cdiv(M, n_m), qm)
    grid_m = _cdiv(M, tm)

    # Megacore: guarantee >=2 blocks along a parallel axis for small shapes so
    # both v7x TensorCores get work.
    if grid_m * grid_n == 1 and M >= 2 * qm:
        tm = _round_up(_cdiv(M, 2), qm)
        grid_m = _cdiv(M, tm)

    grid = (grid_m, grid_n, grid_k)
    b2 = b_half.reshape(1, O)

    # Resident-VMEM estimate (double-buffered inputs + fp32 output block) ->
    # raise the scoped-VMEM limit just enough, with headroom for v7x's 64 MiB.
    xbytes = 2 if precast else 4
    est = 2 * (tm * tk * xbytes + tk * tn * 2 + tn * 2 + tm * tn * 4)
    vmem_limit = min(max(32 << 20, int(est * 1.25) + (2 << 20)), 112 << 20)

    out = pl.pallas_call(
        float16_module_kernel,
        out_shape=jax.ShapeDtypeStruct((M, O), jnp.float32),
        grid_spec=pltpu.PrefetchScalarGridSpec(
            num_scalar_prefetch=0,
            grid=grid,
            in_specs=[
                pl.BlockSpec((tm, tk), lambda i, j, k: (i, k)),  # x tile
                pl.BlockSpec((tk, tn), lambda i, j, k: (k, j)),  # w tile
                pl.BlockSpec((1, tn), lambda i, j, k: (0, j)),   # bias tile
            ],
            out_specs=pl.BlockSpec((tm, tn), lambda i, j, k: (i, j)),
        ),
        compiler_params=pltpu.CompilerParams(
            dimension_semantics=("parallel", "parallel", "arbitrary"),
            vmem_limit_bytes=vmem_limit,
        ),
    )(x2, w_half, b2)

    return out.reshape(B, S, O)


if __name__ == "__main__":
    # Small shapes consistent with a transformer-ish wrapped module.
    B, S, H, O = 2, 8, 32, 32

    key = jax.random.PRNGKey(0)
    kx, kw, kb = jax.random.split(key, 3)

    # fp32 inputs (what Float16Module.forward receives).
    x = jax.random.normal(kx, (B, S, H), dtype=jnp.float32)

    # "module.half()" parameters — cast once at init, never in the hot path.
    w = (jax.random.normal(kw, (H, O), dtype=jnp.float32) * 0.05).astype(HALF)
    b = (jax.random.normal(kb, (O,), dtype=jnp.float32) * 0.01).astype(HALF)

    fwd = jax.jit(float16_module_forward)
    y = jax.block_until_ready(fwd(x, w, b))

    assert y.shape == (B, S, O)
    assert y.dtype == jnp.float32
    assert bool(jnp.all(jnp.isfinite(y)))

    # Plain-JAX reference of the same semantics.
    ref = (
        jnp.dot(
            x.reshape(B * S, H).astype(HALF), w,
            preferred_element_type=jnp.float32,
        )
        + b.astype(jnp.float32)
    ).astype(HALF).astype(jnp.float32).reshape(B, S, O)
    assert bool(jnp.allclose(y, ref, atol=1e-2, rtol=1e-2))

    print("KERNEL_OK")
</pallas_src>

<mosaic_0001>
module attributes {stable_mosaic.version = 11 : i64} {
  func.func @float16_module_kernel(%arg0: i32, %arg1: i32, %arg2: i32, %arg3: memref<8x32xf32, #tpu.memory_space<vmem>>, %arg4: memref<32x32xbf16, #tpu.memory_space<vmem>>, %arg5: memref<1x32xbf16, #tpu.memory_space<vmem>>, %arg6: memref<8x32xf32, #tpu.memory_space<vmem>>) attributes {dimension_semantics = [#tpu.dimension_semantics<parallel>, #tpu.dimension_semantics<parallel>, #tpu.dimension_semantics<arbitrary>], iteration_bounds = array<i64: 2, 1, 1>, scalar_prefetch = 0 : i64, scratch_operands = 0 : i64, tpu.core_type = #tpu.core_type<tc>, window_params = [{transform_indices = @transform_0, window_bounds = array<i64: 8, 32>}, {transform_indices = @transform_1, window_bounds = array<i64: 32, 32>}, {transform_indices = @transform_2, window_bounds = array<i64: 1, 32>}, {transform_indices = @transform_3, window_bounds = array<i64: 8, 32>}]} {
    %c0_i32 = arith.constant 0 : i32
    %0 = arith.cmpi eq, %arg2, %c0_i32 : i32
    %1 = arith.extui %0 : i1 to i32
    %c0_i32_0 = arith.constant 0 : i32
    %2 = arith.cmpi ne, %1, %c0_i32_0 : i32
    scf.if %2 {
      %cst_10 = arith.constant 0.000000e+00 : f32
      %13 = vector.broadcast %cst_10 : f32 to vector<8x32xf32>
      %c0_11 = arith.constant 0 : index
      %c0_12 = arith.constant 0 : index
      %14 = vector.load %arg6[%c0_11, %c0_12] : memref<8x32xf32, #tpu.memory_space<vmem>>, vector<8x32xf32>
      tpu.vector_store %arg6[%c0_11, %c0_12], %13 {strides = array<i32>} : memref<8x32xf32, #tpu.memory_space<vmem>>, vector<8x32xf32>,
    } else {
    }
    %c0 = arith.constant 0 : index
    %c0_1 = arith.constant 0 : index
    %3 = vector.load %arg3[%c0, %c0_1] : memref<8x32xf32, #tpu.memory_space<vmem>>, vector<8x32xf32>
    %4 = arith.truncf %3 : vector<8x32xf32> to vector<8x32xbf16>
    %c0_2 = arith.constant 0 : index
    %c0_3 = arith.constant 0 : index
    %5 = vector.load %arg6[%c0_2, %c0_3] : memref<8x32xf32, #tpu.memory_space<vmem>>, vector<8x32xf32>
    %c0_4 = arith.constant 0 : index
    %c0_5 = arith.constant 0 : index
    %6 = vector.load %arg4[%c0_4, %c0_5] : memref<32x32xbf16, #tpu.memory_space<vmem>>, vector<32x32xbf16>
    %cst = arith.constant dense<0.000000e+00> : vector<8x32xf32>
    %7 = tpu.matmul %4, %6, %cst {dimension_numbers = #tpu.dot_dimension_numbers<[1], [0], [0], [1], [0, 0, 1, 1], [], []>} : vector<8x32xbf16>, vector<32x32xbf16>, vector<8x32xf32> -> vector<8x32xf32>
    %8 = arith.addf %5, %7 : vector<8x32xf32>
    %c0_6 = arith.constant 0 : index
    %c0_7 = arith.constant 0 : index
    %9 = vector.load %arg6[%c0_6, %c0_7] : memref<8x32xf32, #tpu.memory_space<vmem>>, vector<8x32xf32>
    tpu.vector_store %arg6[%c0_6, %c0_7], %8 {strides = array<i32>} : memref<8x32xf32, #tpu.memory_space<vmem>>, vector<8x32xf32>,
    %c0_i32_8 = arith.constant 0 : i32
    %10 = arith.cmpi eq, %arg2, %c0_i32_8 : i32
    %11 = arith.extui %10 : i1 to i32
    %c0_i32_9 = arith.constant 0 : i32
    %12 = arith.cmpi ne, %11, %c0_i32_9 : i32
    scf.if %12 {
      %c0_10 = arith.constant 0 : index
      %c0_11 = arith.constant 0 : index
      %13 = vector.load %arg6[%c0_10, %c0_11] : memref<8x32xf32, #tpu.memory_space<vmem>>, vector<8x32xf32>
      %c0_12 = arith.constant 0 : index
      %c0_13 = arith.constant 0 : index
      %14 = vector.load %arg5[%c0_12, %c0_13] : memref<1x32xbf16, #tpu.memory_space<vmem>>, vector<1x32xbf16>
      %15 = arith.extf %14 : vector<1x32xbf16> to vector<1x32xf32>
      %16 = vector.broadcast %15 : vector<1x32xf32> to vector<8x32xf32>
      %17 = arith.addf %13, %16 : vector<8x32xf32>
      %18 = arith.truncf %17 : vector<8x32xf32> to vector<8x32xbf16>
      %19 = arith.extf %18 : vector<8x32xbf16> to vector<8x32xf32>
      %c0_14 = arith.constant 0 : index
      %c0_15 = arith.constant 0 : index
      %20 = vector.load %arg6[%c0_14, %c0_15] : memref<8x32xf32, #tpu.memory_space<vmem>>, vector<8x32xf32>
      tpu.vector_store %arg6[%c0_14, %c0_15], %19 {strides = array<i32>} : memref<8x32xf32, #tpu.memory_space<vmem>>, vector<8x32xf32>,
    } else {
    }
    return
  }
  func.func @transform_0(%arg0: i32, %arg1: i32, %arg2: i32) -> (i32, i32) {
    %c0_i32 = arith.constant 0 : i32
    return %arg0, %arg2 : i32, i32
  }
  func.func @transform_1(%arg0: i32, %arg1: i32, %arg2: i32) -> (i32, i32) {
    %c0_i32 = arith.constant 0 : i32
    return %arg2, %arg1 : i32, i32
  }
  func.func @transform_2(%arg0: i32, %arg1: i32, %arg2: i32) -> (i32, i32) {
    %c0_i32 = arith.constant 0 : i32
    %c0_i32_0 = arith.constant 0 : i32
    return %c0_i32, %arg1 : i32, i32
  }
  func.func @transform_3(%arg0: i32, %arg1: i32, %arg2: i32) -> (i32, i32) {
    %c0_i32 = arith.constant 0 : i32
    return %arg0, %arg1 : i32, i32
  }
}

</mosaic_0001>

<bundles_post_ra>
// kernel: float16_module_forward.1
= control target key start
LH: loop header
LB: loop body
LE: loop exit
PB: predicated region body
PF: predicated region fallthrough
CT: control target
= control target key end

     0   :  { %8 = vsyncpa [#allocation3], 0  ;;  %s972_s0 = inlined_call_operand.hbm [shape: f32[16,32], index: 0, kind: input, shape index: {}]   ;;  %s973_s1 = inlined_call_operand.hbm [shape: bf16[32,32], index: 1, kind: input, shape index: {}]   ;;  %s974_s2 = inlined_call_operand.vmem [shape: bf16[1,32], index: 2, kind: input, shape index: {}]   ;;  %s975_s3 = inlined_call_operand.hbm [shape: f32[16,32], index: 3, kind: output, shape index: {}]  }
   0x1   :  { %10 = vsyncpa [#allocation3 + $0x1], 0 }
   0x2   :  { %11 = vsyncpa [#allocation6], 0 }
   0x3   :  { %12 = vsyncpa [#allocation4], 0 }
   0x4   :  { %14 = vsyncpa [#allocation4 + $0x1], 0  ;;  %s743_s12 = smov 0   ;;  %s745_s13 = smov 0  }
   0x5   :  { %s747_s14 = smov 0   ;;  %s749_s15 = smov 0  }
   0x6   :  { %s751_s16 = smov 0   ;;  %s753_s17 = smov 0  }
   0x7 LB: > { %s461_s18 = sadd.s32 4294967295, %s714_s17   ;;  %s462_s19 = sadd.s32 4294967294, %s714_s17   ;;  %s714_s17 = sphi %s753_s17, %s20_s17   ;;  %s710_s16 = sphi %s751_s16, %s999_s16   ;;  %s706_s15 = sphi %s749_s15, %s998_s15   ;;  %s702_s14 = sphi %s747_s14, %s997_s14   ;;  %s698_s13 = sphi %s745_s13, %s996_s13   ;;  %s694_s12 = sphi %s743_s12, %s995_s12  }
   0x8   : > { %p61_p0 = scmp.ne.s32.totalorder %s698_s13, %s694_s12  ;;  %p777_p1 = scmp.eq.s32.totalorder %s461_s18, 0 }
   0x9   : > { %p781_p2 = scmp.eq.s32.totalorder %s461_s18, 1  ;;  %p147_p3 = scmp.eq.s32.totalorder %s462_s19, 1 }
   0xa   : > { %s980_s20 = scalar_select %p777_p1, 1, 0 }
   0xb   : > { %s981_s21 = scalar_select %p781_p2, 1, 0 }
   0xc   : > { %p787_p4 = por %p777_p1, %p61_p0  ;;  %p463_p5 = scmp.ge.s32.totalorder %s714_s17, 1 }
   0xd   : > { %p792_p6 = por %p147_p3, %p61_p0  ;;  %p154_p7 = scmp.lt.s32.totalorder %s714_s17, 3 }
   0xe   : > { %s982_s22 = scalar_select %p787_p4, 1, 0 }
   0xf   : > { %s983_s23 = scalar_select %p792_p6, 1, 0 }
  0x10   : > { %p797_p8 = pnand %p463_p5, %p154_p7  ;;  %s716_s25 = smov [#allocation5]  }
  0x11   : > { %s170_s26 = sshll.u32 %s716_s25, 4  ;;  %s39_s28 = sadd.s32 1, %s710_s16  ;;  %s171_s26 = int_to_ptr.vmem [resolvable:$true] %s170_s26 }
  0x12   : > { %s984_s24 = scalar_select %p797_p8, 1, 0 }
  0x13   : > { %p499_p9 = pneg %p797_p8  ;;  %s570_s4 = scalar_lea.hbm %s973_s1, 256 }
  0x14   : > { %p571_p12 = scmp.ne.s32.totalorder %s973_s1, %s570_s4  ;;  %p577_p5 = scmp.lt.u32.totalorder %s570_s4, %s973_s1 }
  0x15   : > { %p806_p11 = pnand %p499_p9, %p777_p1 }
  0x17   : > { %p572_p13 = pneg %p806_p11 }
  0x19   : > { %p573_p0 = pnand %p572_p13, %p571_p12 }
  0x1b   : > { %p574_p3 = pneg %p573_p0 }
  0x1d   : > { %p579_p7 = pnand %p577_p5, %p574_p3 }
  0x1f   : > { %582 = shalt.err (!%p579_p7)
}
  0x20   : > { %s583_s9 = scalar_lea.vmem %s171_s26, 256  ;;  %p591_p1 = scmp.lt.s32.totalorder %s171_s26, %s171_s26 }
  0x21   : > { %p584_p9 = scmp.ne.s32.totalorder %s171_s26, %s583_s9  ;;  %p592_p4 = scmp.lt.s32.totalorder %s583_s9, %s583_s9 }
  0x23   : > { %p586_p10 = pnand %p584_p9, %p572_p13  ;;  %p593_p8 = por %p592_p4, %p591_p1 }
  0x25   : > { %p587_p6 = pneg %p586_p10 }
  0x27   : > { %p594_p2 = pnand %p593_p8, %p587_p6 }
  0x29   : > { %597 = shalt.err (!%p594_p2)
}
  0x2a   : > { %s717_s10 = smov 64   ;;  %s718_s11 = smov 4  }
  0x2b   : > { %502 = dma.hbm_to_vmem [thread:$0]  (!%p806_p11), %s973_s1, 256, %s171_s26, [#allocation6], %s717_s10, %s717_s10, %s718_s11  }
  0x2c   : > { %p41_p1 = scmp.ge.s32.totalorder %s39_s28, 2  ;;  %s48_s25 = sadd.s32 1, %s702_s14 }
  0x2d   : > { %p55_p2 = scmp.ne.s32.totalorder %s702_s14, %s698_s13  ;;  %p56_p4 = scmp.eq.s32.totalorder %s714_s17, 0 }
  0x2e   : > { %s1001_s28 = smov (%p41_p1, %s39_s28), 0  ;;  %p987_p8 = scmp.ne.s32.totalorder %s981_s21, 0 }
  0x2f   : > { %p833_p6 = por %p56_p4, %p55_p2  ;;  %s43_s27 = ssub.s32 %s710_s16, %s1001_s28 }
  0x30   : > { %p839_p10 = por %p987_p8, %p55_p2  ;;  %p512_p12 = scmp.lt.s32.totalorder %s714_s17, 2 }
  0x31   : > { %p46_p11 = scmp.eq.s32.totalorder %s43_s27, 0  ;;  %s190_s26 = sand.u32 1, %s702_s14  }
  0x32   : > { %s467_s4 = sshll.u32 %s190_s26, 3  ;;  %s468_s6 = sshll.u32 %s710_s16, 7 }
  0x33   : > { %s848_s5 = scalar_select %p46_p11, %s702_s14, %s48_s25  }
  0x34   : > { %s854_s9 = scalar_lea.hbm %s972_s0, %s468_s6  ;;  %s194_s21 = scalar_lea.vmem [#allocation2], %s467_s4 }
  0x35   : > { %s202_s10 = sshll.u32 %s194_s21, 4  ;;  %p860_p13 = pnand %p512_p12, %p833_p6  ;;  %s856_s10 = int_to_ptr.vmem [resolvable:$true] %s202_s10 }
  0x36   : > { %s191_s18 = scalar_lea.sflag [#allocation3], %s190_s26  ;;  %s598_s19 = scalar_lea.hbm %s854_s9, 128 }
  0x37   : > { %p599_p0 = scmp.ne.s32.totalorder %s854_s9, %s598_s19  ;;  %p600_p3 = pneg %p860_p13 }
  0x38   : > { %s603_s4 = scalar_lea.hbm %s972_s0, 256  ;;  %p604_p9 = scmp.lt.u32.totalorder %s854_s9, %s972_s0 }
  0x39   : > { %p601_p5 = pnand %p600_p3, %p599_p0  ;;  %p605_p1 = scmp.lt.u32.totalorder %s603_s4, %s598_s19 }
  0x3a   : > { %p607_p4 = scmp.lt.u32.totalorder %s598_s19, %s854_s9 }
  0x3b   : > { %p602_p7 = pneg %p601_p5  ;;  %p606_p2 = por %p605_p1, %p604_p9 }
  0x3d   : > { %p608_p6 = por %p607_p4, %p606_p2 }
  0x3f   : > { %p609_p8 = pnand %p608_p6, %p602_p7 }
  0x41   : > { %612 = shalt.err (!%p609_p8)
}
  0x42   : > { %s613_s26 = scalar_lea.vmem %s856_s10, 128  ;;  %s719_s7 = smov [#allocation2]  }
  0x43   : > { %p614_p12 = scmp.ne.s32.totalorder %s856_s10, %s613_s26  ;;  %s618_s8 = sshll.u32 %s719_s7, 4  ;;  %s619_s8 = int_to_ptr.vmem [resolvable:$false] %s618_s8 }
  0x44   : > { %s620_s21 = scalar_lea.vmem %s619_s8, 256  ;;  %p621_p5 = scmp.lt.s32.totalorder %s856_s10, %s619_s8 }
  0x45   : > { %p616_p11 = pnand %p614_p12, %p600_p3  ;;  %p622_p9 = scmp.lt.s32.totalorder %s620_s21, %s613_s26 }
  0x47   : > { %p617_p0 = pneg %p616_p11  ;;  %p623_p1 = por %p622_p9, %p621_p5 }
  0x49   : > { %p624_p2 = pnand %p623_p1, %p617_p0 }
  0x4b   : > { %627 = shalt.err (!%p624_p2)
}
  0x4c   : > { %506 = dma.hbm_to_vmem [thread:$0]  (!%p860_p13), %s854_s9, 128, %s856_s10, %s191_s18  }
  0x4d   : > { %p990_p7 = scmp.ne.s32.totalorder %s984_s24, 0 }
  0x4e   : > { %s892_s19 = sand.u32 (!%p990_p7), 1, %s698_s13   ;;  %p991_p3 = scmp.ne.s32.totalorder (!%p990_p7), %s982_s22, 0 }
  0x4f   : > { %211 = sbr.rel (%p990_p7) target bundleno = 341 (0x155), region = 32  ;;  %s470_s25 = sshll.u32 (!%p990_p7), %s892_s19, 3 }
  0x50   : > { %s214_s27 = scalar_lea.sflag (!%p990_p7), [#allocation3], %s892_s19  ;;  %s217_s4 = scalar_lea.vmem (!%p990_p7), [#allocation2], %s470_s25 }
  0x56   : > { %681 = dma.done.wait (%p991_p3), %s214_s27, 128  }
  0x57   : > { %683 = vsyncadd (%p991_p3), %s214_s27, 4294967168  ;;  %p992_p4 = scmp.ne.s32.totalorder %s980_s20, 0 }
  0x59   : > { %685 = dma.done.wait (%p992_p4), [#allocation6], 256  }
  0x5a   : > { %687 = vsyncadd (%p992_p4), [#allocation6], 4294967040  ;;  %vm256_vm0 = vcmask 261120   ;;  %v720_v0 = vmov 0.0   ;;  %vm721_vm1 = vmmov 0   ;;  %s904_s24 = scalar_lea.vmem [#allocation7], %s470_s25  ;;  %v329_v5 = vlaneseq }
  0x5b   : > { %483 = vmatprep.subr.bf16.mxu0 %v720_v0  ;;  %487 = vmatprep.mubr.msk.bf16.mxu0 %vm721_vm1, %v720_v0  ;;  %257 = vst.msk [vmem:[%s904_s24] sm:$0xff] %vm256_vm0, %v720_v0  ;;  %v568_v1 = vld [vmem:[#allocation5] sm:$0xff]   ;;  %v569_v2 = vld [vmem:[#allocation5 + $0x8] sm:$0xff]   ;;  %v258_v3 = vld [vmem:[%s217_s4] sm:$0xff]  ;;  %s477_s9 = sshll.u32 %s706_s15, 7  ;;  %s352_s10 = sshll.u32 %s904_s24, 4  ;;  %s923_s10 = int_to_ptr.vmem [resolvable:$true] %s352_s10 }
  0x5c   : > { %484 = vmatpush3.bf16.msra.mxu0 %v568_v1  ;;  %v259_v4 = vpack.c.bf16 %v258_v3, %v258_v3  ;;  %v330_v7 = vshrl.u32 %v329_v5, 7  ;;  %v327_v9 = vld [vmem:[%s974_s2] sm:$0x1]  ;;  %s921_s29 = scalar_lea.hbm %s975_s3, %s477_s9  ;;  %s338_s6 = scalar_lea.sflag [#allocation4], %s892_s19 }
  0x5d   : > { %485 = vmatprep.subr.bf16.mxu0 %v720_v0  ;;  %v328_v14 = vunpack.c.l.bf16 %v327_v9  ;;  %s628_s26 = scalar_lea.vmem %s923_s10, 128  ;;  %s722_s15 = smov [#allocation7]  }
  0x5e   : > { %v331_v15 = vsub.s32 0, %v330_v7  ;;  %p629_p13 = scmp.ne.s32.totalorder %s923_s10, %s628_s26  ;;  %s632_s7 = sshll.u32 %s722_s15, 4  ;;  %s633_s7 = int_to_ptr.vmem [resolvable:$false] %s632_s7 }
  0x5f   : > { %s634_s8 = scalar_lea.vmem %s633_s7, 256  ;;  %p635_p12 = scmp.lt.s32.totalorder %s923_s10, %s633_s7 }
  0x60   : > { %486 = vmatpush3.bf16.msra.mxu0 %v569_v2  ;;  %v332_v16 = vrot.slane %v328_v14, %v331_v15  ;;  %p630_p6 = pnand %p629_p13, %p839_p10  ;;  %p636_p11 = scmp.lt.s32.totalorder %s634_s8, %s628_s26 }
  0x62   : > { %v260_v6 = vld [vmem:[%s904_s24] sm:$0xff]  ;;  %p631_p8 = pneg %p630_p6  ;;  %p637_p0 = por %p636_p11, %p635_p12 }
  0x63   : > { %488 = vmatmul.mubr.msk.bf16.vlgmr.msra.gmra.mrb[0].mxu0 %vm256_vm0, %v259_v4 }
  0x64   : > { %p638_p5 = pnand %p637_p0, %p631_p8 }
 0x136   : > { %v315_v8 = vpop.f32.mrb[0].mxu0 }
 0x137   : > { %v321_v10 = vadd.f32 %v315_v8, %v260_v6  ;;  %v489_v11 = vpop.f32.mrb[1].mxu0 }
 0x138   : > { %v318_v12 = vpop.f32.mrb[2].mxu0 }
 0x139   : > { %322 = vst.msk [vmem:[%s904_s24] sm:$0xff] %vm256_vm0, %v321_v10  ;;  %v490_v13 = vpop.f32.mrb[3].mxu0 }
 0x140   : > { %v326_v17 = vld [vmem:[%s904_s24] sm:$0xff] }
 0x141   : > { %v333_v18 = vadd.f32 %v332_v16, %v326_v17 }
 0x143   : > { %v334_v19 = vpack.c.bf16 %v333_v18, %v333_v18 }
 0x145   : > { %v335_v20 = vunpack.c.l.bf16 %v334_v19 }
 0x147   : > { %336 = vst.msk [vmem:[%s904_s24] sm:$0xff] %vm256_vm0, %v335_v20 }
 0x148   : > { %641 = shalt.err (!%p638_p5)
}
 0x149   : > { %s642_s21 = scalar_lea.hbm %s921_s29, 128  ;;  %s646_s27 = scalar_lea.hbm %s975_s3, 256 }
 0x14a   : > { %p643_p9 = scmp.ne.s32.totalorder %s921_s29, %s642_s21  ;;  %p647_p7 = scmp.lt.u32.totalorder %s921_s29, %s975_s3 }
 0x14b   : > { %p648_p3 = scmp.lt.u32.totalorder %s646_s27, %s642_s21  ;;  %p650_p13 = scmp.lt.u32.totalorder %s642_s21, %s921_s29 }
 0x14c   : > { %p644_p1 = pnand %p643_p9, %p839_p10 }
 0x14d   : > { %p649_p4 = por %p648_p3, %p647_p7 }
 0x14e   : > { %p645_p2 = pneg %p644_p1 }
 0x14f   : > { %p651_p6 = por %p650_p13, %p649_p4 }
 0x151   : > { %p652_p8 = pnand %p651_p6, %p645_p2 }
 0x153   : > { %655 = shalt.err (!%p652_p8)
}
 0x154   : > { %497 = dma.vmem_to_hbm [thread:$0]  (%p839_p10), %s923_s10, 128, %s921_s29, %s338_s6  }
 0x155 PF: > { %s364_s20 = sand.u32 1, %s694_s12   ;;  %p993_p12 = scmp.ne.s32.totalorder %s983_s23, 0 }
 0x156   : > { %p994_p11 = scmp.ge.s32.totalorder %s714_s17, 2  ;;  %s365_s22 = scalar_lea.sflag [#allocation4], %s364_s20 }
 0x158   : > { %p508_p0 = pnand %p994_p11, %p993_p12 }
 0x15a   : > { %689 = dma.done.wait (!%p508_p0), %s365_s22, 128  }
 0x15b   : > { %691 = vsyncadd (!%p508_p0), %s365_s22, 4294967168  ;;  %s20_s17 = sadd.s32 1, %s714_s17   ;;  %s995_s12 = smov %s698_s13 }
 0x15c   : > { %p17_p5 = scmp.ge.s32.totalorder %s20_s17, 4   ;;  %s996_s13 = smov %s702_s14 }
 0x15d   : > { %s997_s14 = smov %s848_s5  ;;  %s998_s15 = smov %s710_s16 }
 0x15e   : > { %s999_s16 = smov %s1001_s28  ;;  %19 = sbr.rel (!%p17_p5) target bundleno = 7 (0x7), region = 93 }
 0x165   :  { %370 = vsyncpa [#allocation3], 1 }
 0x166   :  { %372 = vsyncpa [#allocation3 + $0x1], 1 }
 0x167   :  { %373 = vsyncpa [#allocation6], 1 }
 0x168   :  { %374 = vsyncpa [#allocation4], 1 }
 0x169   :  { %376 = vsyncpa [#allocation4 + $0x1], 1 }

</bundles_post_ra>
